<compile_context>
chip_gen: v7x
topology: tpu7x:2x2x1
jax: 0.10.0
libtpu: 0.0.40
codegen_flags: <defaults>
</compile_context>

<pallas_src>
import jax
import jax.numpy as jnp
from jax.experimental import pallas as pl
from jax.experimental.pallas import tpu as pltpu

OFFSET = 0.5
SCALE = 0.5
PAD_BASE_SIZE = 8
LANES = 128
# TODO(synk): the `_get_padding` / F.pad branch never triggers for H, W
# divisible by pad_base_size; if ever needed it is plain-JAX glue (jnp.pad/crop).


def _band_matrix(w_hwio, img_w, img_c):
    """(3*128, 128) stacked banded matrices: the 3x3 conv as ONE row matmul.

    The flat NHWC image is viewed as 128-lane rows, each holding
    RP = 128/(W*C) consecutive image rows.  For source-lane-row offset
    delta in {-1, 0, +1} (stacked along K in that order):
        M_delta[(r_in,w_in,cin), (r_out,w_out,cout)] =
            w_hwio[dh+1, dw+1, cin, cout]  if |dh| <= 1 and |dw| <= 1 else 0
        with dh = RP*delta + r_in - r_out,  dw = w_in - w_out.
    The W-direction zero padding is implicit in the band structure.
    """
    rp = LANES // (img_w * img_c)
    shape = (rp, img_w, img_c, rp, img_w, img_c)
    r_in = jnp.arange(rp).reshape(rp, 1, 1, 1, 1, 1)
    w_in = jnp.arange(img_w).reshape(1, img_w, 1, 1, 1, 1)
    c_in = jnp.arange(img_c).reshape(1, 1, img_c, 1, 1, 1)
    r_out = jnp.arange(rp).reshape(1, 1, 1, rp, 1, 1)
    w_out = jnp.arange(img_w).reshape(1, 1, 1, 1, img_w, 1)
    c_out = jnp.arange(img_c).reshape(1, 1, 1, 1, 1, img_c)
    dw = w_in - w_out
    mats = []
    for delta in (-1, 0, 1):
        dh = rp * delta + r_in - r_out
        ok = (jnp.abs(dh) <= 1) & (jnp.abs(dw) <= 1)
        kh = jnp.clip(dh + 1, 0, 2)
        kw = jnp.clip(dw + 1, 0, 2)
        vals = w_hwio[jnp.broadcast_to(kh, shape),
                      jnp.broadcast_to(kw, shape),
                      jnp.broadcast_to(c_in, shape),
                      jnp.broadcast_to(c_out, shape)]
        vals = jnp.where(jnp.broadcast_to(ok, shape), vals, 0.0)
        mats.append(vals.reshape(LANES, LANES))
    # TODO(synk): on v6e/v7x cast to bfloat16 for the bf16-native MXU and half
    # the weight DMA; kept f32 so the 1e-4 check vs the f32 reference holds.
    return jnp.concatenate(mats, axis=0).astype(jnp.float32)   # (384, 128)


def restoration_kernel(x_ref, mats_ref, bias_ref, mdn_ref, mup_ref, o_ref):
    """Restores a block of whole images.

    x_ref:    (rows, 128)  flat NHWC distorted pixels (lane-dense)
    mats_ref: (384, 128)   stacked banded conv matrices (delta = -1, 0, +1)
    bias_ref: (1, 128)     bias * scale, tiled across the lane dim
    mdn_ref:  (rows, 1)    0 on the first lane-row of each image, else 1
    mup_ref:  (rows, 1)    0 on the last  lane-row of each image, else 1
    o_ref:    (rows, 128)  restored output
    """
    x = x_ref[...].astype(jnp.float32)
    xm = x - OFFSET                    # the /scale ... *scale pair folds out exactly
    rows = x.shape[0]
    # H-direction halo: neighbouring 128-lane rows via static-shift XLU rolls
    # (non-negative shifts only: rows-1 == cyclic shift by -1), zeroed at image
    # edges by precomputed {0,1} masks (two VPU multiplies).
    x_dn = pltpu.roll(xm, 1, 0) * mdn_ref[...]
    x_up = pltpu.roll(xm, rows - 1, 0) * mup_ref[...]
    # One fused MXU matmul instead of three K=128 dots.
    xin = jnp.concatenate([x_dn, xm, x_up], axis=1)          # (rows, 384)
    y = jnp.dot(xin, mats_ref[...], preferred_element_type=jnp.float32)
    o_ref[...] = (x + y + bias_ref[...]).astype(o_ref.dtype)


def restoration_forward_nhwc(x_nhwc, w_oihw, bias):
    """NHWC-native entry point: no layout transposes, just a free reshape to
    the lane-dense (rows, 128) slab."""
    n, h, w, c = x_nhwc.shape
    assert LANES % (w * c) == 0, "W*C must divide 128 for the lane-dense layout"
    rp = LANES // (w * c)
    assert h % rp == 0
    rows_per_image = h // rp
    total_rows = n * rows_per_image

    x_flat = x_nhwc.reshape(total_rows, LANES)
    w_hwio = jnp.transpose(w_oihw, (2, 3, 1, 0))
    mats = _band_matrix(w_hwio, w, c)
    bias_tiled = jnp.tile(bias.astype(jnp.float32) * SCALE,
                          LANES // c).reshape(1, LANES)

    # Single grid step unless a block would exceed ~2 MiB of f32 rows (review:
    # on 1-TC chips extra grid steps are pure overhead and re-push MXU weights;
    # large blocks amortize the weight load).  Blocks always split on whole-
    # image boundaries -- there is no cross-block halo exchange.
    max_block_rows = 4096
    grid_n = 1
    if total_rows > max_block_rows:
        grid_n = n
        for g in range(2, n + 1):
            if n % g == 0 and (n // g) * rows_per_image <= max_block_rows:
                grid_n = g
                break
    block_rows = (n // grid_n) * rows_per_image

    row_idx = jnp.arange(block_rows)
    mask_dn = (row_idx % rows_per_image != 0).astype(jnp.float32)
    mask_up = (row_idx % rows_per_image != rows_per_image - 1).astype(jnp.float32)
    mask_dn = mask_dn.reshape(block_rows, 1)
    mask_up = mask_up.reshape(block_rows, 1)

    out_flat = pl.pallas_call(
        restoration_kernel,
        out_shape=jax.ShapeDtypeStruct((total_rows, LANES), x_nhwc.dtype),
        grid_spec=pltpu.PrefetchScalarGridSpec(
            num_scalar_prefetch=0,
            grid=(grid_n,),
            in_specs=[
                pl.BlockSpec((block_rows, LANES), lambda i: (i, 0)),
                # Constant-index blocks (weights / bias / masks) stay resident
                # in VMEM across grid steps.  Total footprint < 1 MiB, so no
                # need to trim their second pipeline buffer here.
                pl.BlockSpec((3 * LANES, LANES), lambda i: (0, 0)),
                pl.BlockSpec((1, LANES), lambda i: (0, 0)),
                pl.BlockSpec((block_rows, 1), lambda i: (0, 0)),
                pl.BlockSpec((block_rows, 1), lambda i: (0, 0)),
            ],
            out_specs=pl.BlockSpec((block_rows, LANES), lambda i: (i, 0)),
        ),
        compiler_params=pltpu.CompilerParams(
            dimension_semantics=("parallel",)),
    )(x_flat, mats, bias_tiled, mask_dn, mask_up)

    return out_flat.reshape(n, h, w, c)


@jax.jit
def restoration_forward_nchw(x_nchw, w_oihw, bias):
    """Compatibility glue for the PyTorch NCHW layout.  For a memory-bound op
    these two transposes dominate end-to-end HBM traffic at scale; prefer
    calling restoration_forward_nhwc directly when the surrounding pipeline
    can be kept in NHWC."""
    x_nhwc = jnp.transpose(x_nchw, (0, 2, 3, 1))
    out_nhwc = restoration_forward_nhwc(x_nhwc, w_oihw, bias)
    return jnp.transpose(out_nhwc, (0, 3, 1, 2))


def reference_nchw(x_nchw, w_oihw, bias):
    xn = (x_nchw - OFFSET) / SCALE
    y = jax.lax.conv_general_dilated(
        xn, w_oihw, window_strides=(1, 1), padding="SAME",
        dimension_numbers=("NCHW", "OIHW", "NCHW"),
    ) + bias[None, :, None, None]
    return x_nchw + y * SCALE


if __name__ == "__main__":
    N, C, H, W = 2, 4, 16, 16

    key = jax.random.PRNGKey(0)
    kx, kw, kb = jax.random.split(key, 3)
    x = jax.random.normal(kx, (N, C, H, W), dtype=jnp.float32)
    w = jax.random.normal(kw, (C, C, 3, 3), dtype=jnp.float32) * 0.1  # OIHW
    b = jax.random.normal(kb, (C,), dtype=jnp.float32) * 0.1

    out = jax.block_until_ready(restoration_forward_nchw(x, w, b))
    ref = jax.block_until_ready(reference_nchw(x, w, b))
    assert out.shape == (N, C, H, W)
    assert jnp.allclose(out, ref, atol=1e-4, rtol=1e-4), "mismatch vs reference"

    print("KERNEL_OK")
</pallas_src>

<mosaic_0001>
module attributes {stable_mosaic.version = 11 : i64} {
  func.func @restoration_kernel(%arg0: i32, %arg1: memref<16x128xf32, #tpu.memory_space<vmem>>, %arg2: memref<384x128xf32, #tpu.memory_space<vmem>>, %arg3: memref<1x128xf32, #tpu.memory_space<vmem>>, %arg4: memref<16x1xf32, #tpu.memory_space<vmem>>, %arg5: memref<16x1xf32, #tpu.memory_space<vmem>>, %arg6: memref<16x128xf32, #tpu.memory_space<vmem>>) attributes {dimension_semantics = [#tpu.dimension_semantics<parallel>], iteration_bounds = array<i64: 1>, scalar_prefetch = 0 : i64, scratch_operands = 0 : i64, tpu.core_type = #tpu.core_type<tc>, window_params = [{transform_indices = @transform_0, window_bounds = array<i64: 16, 128>}, {pipeline_mode = #tpu.pipeline_mode<synchronous>, transform_indices = @transform_1, window_bounds = array<i64: 384, 128>}, {pipeline_mode = #tpu.pipeline_mode<synchronous>, transform_indices = @transform_2, window_bounds = array<i64: 1, 128>}, {pipeline_mode = #tpu.pipeline_mode<synchronous>, transform_indices = @transform_3, window_bounds = array<i64: 16, 1>}, {pipeline_mode = #tpu.pipeline_mode<synchronous>, transform_indices = @transform_4, window_bounds = array<i64: 16, 1>}, {transform_indices = @transform_5, window_bounds = array<i64: 16, 128>}]} {
    %c0 = arith.constant 0 : index
    %c0_0 = arith.constant 0 : index
    %0 = vector.load %arg1[%c0, %c0_0] : memref<16x128xf32, #tpu.memory_space<vmem>>, vector<16x128xf32>
    %cst = arith.constant 5.000000e-01 : f32
    %1 = vector.broadcast %cst : f32 to vector<16x128xf32>
    %2 = arith.subf %0, %1 : vector<16x128xf32>
    %c1_i32 = arith.constant 1 : i32
    %3 = tpu.dynamic_rotate %2 by %c1_i32 dim 0 : vector<16x128xf32>, i32 -> vector<16x128xf32>
    %c0_1 = arith.constant 0 : index
    %c0_2 = arith.constant 0 : index
    %4 = vector.load %arg4[%c0_1, %c0_2] : memref<16x1xf32, #tpu.memory_space<vmem>>, vector<16x1xf32>
    %5 = vector.broadcast %4 : vector<16x1xf32> to vector<16x128xf32>
    %6 = arith.mulf %3, %5 : vector<16x128xf32>
    %c15_i32 = arith.constant 15 : i32
    %7 = tpu.dynamic_rotate %2 by %c15_i32 dim 0 : vector<16x128xf32>, i32 -> vector<16x128xf32>
    %c0_3 = arith.constant 0 : index
    %c0_4 = arith.constant 0 : index
    %8 = vector.load %arg5[%c0_3, %c0_4] : memref<16x1xf32, #tpu.memory_space<vmem>>, vector<16x1xf32>
    %9 = vector.broadcast %8 : vector<16x1xf32> to vector<16x128xf32>
    %10 = arith.mulf %7, %9 : vector<16x128xf32>
    %11 = tpu.concatenate %6, %2, %10 in 1 : vector<16x128xf32>, vector<16x128xf32>, vector<16x128xf32> -> vector<16x384xf32>
    %c0_5 = arith.constant 0 : index
    %c0_6 = arith.constant 0 : index
    %12 = vector.load %arg2[%c0_5, %c0_6] : memref<384x128xf32, #tpu.memory_space<vmem>>, vector<384x128xf32>
    %cst_7 = arith.constant dense<0.000000e+00> : vector<16x128xf32>
    %13 = tpu.matmul %11, %12, %cst_7 {dimension_numbers = #tpu.dot_dimension_numbers<[1], [0], [0], [1], [0, 0, 1, 1], [], []>} : vector<16x384xf32>, vector<384x128xf32>, vector<16x128xf32> -> vector<16x128xf32>
    %14 = arith.addf %0, %13 : vector<16x128xf32>
    %c0_8 = arith.constant 0 : index
    %c0_9 = arith.constant 0 : index
    %15 = vector.load %arg3[%c0_8, %c0_9] : memref<1x128xf32, #tpu.memory_space<vmem>>, vector<1x128xf32>
    %16 = vector.broadcast %15 : vector<1x128xf32> to vector<16x128xf32>
    %17 = arith.addf %14, %16 : vector<16x128xf32>
    %c0_10 = arith.constant 0 : index
    %c0_11 = arith.constant 0 : index
    %18 = vector.load %arg6[%c0_10, %c0_11] : memref<16x128xf32, #tpu.memory_space<vmem>>, vector<16x128xf32>
    tpu.vector_store %arg6[%c0_10, %c0_11], %17 {strides = array<i32>} : memref<16x128xf32, #tpu.memory_space<vmem>>, vector<16x128xf32>,
    return
  }
  func.func @transform_0(%arg0: i32) -> (i32, i32) {
    %c0_i32 = arith.constant 0 : i32
    %c0_i32_0 = arith.constant 0 : i32
    return %arg0, %c0_i32 : i32, i32
  }
  func.func @transform_1(%arg0: i32) -> (i32, i32) {
    %c0_i32 = arith.constant 0 : i32
    %c0_i32_0 = arith.constant 0 : i32
    %c0_i32_1 = arith.constant 0 : i32
    return %c0_i32, %c0_i32_0 : i32, i32
  }
  func.func @transform_2(%arg0: i32) -> (i32, i32) {
    %c0_i32 = arith.constant 0 : i32
    %c0_i32_0 = arith.constant 0 : i32
    %c0_i32_1 = arith.constant 0 : i32
    return %c0_i32, %c0_i32_0 : i32, i32
  }
  func.func @transform_3(%arg0: i32) -> (i32, i32) {
    %c0_i32 = arith.constant 0 : i32
    %c0_i32_0 = arith.constant 0 : i32
    %c0_i32_1 = arith.constant 0 : i32
    return %c0_i32, %c0_i32_0 : i32, i32
  }
  func.func @transform_4(%arg0: i32) -> (i32, i32) {
    %c0_i32 = arith.constant 0 : i32
    %c0_i32_0 = arith.constant 0 : i32
    %c0_i32_1 = arith.constant 0 : i32
    return %c0_i32, %c0_i32_0 : i32, i32
  }
  func.func @transform_5(%arg0: i32) -> (i32, i32) {
    %c0_i32 = arith.constant 0 : i32
    %c0_i32_0 = arith.constant 0 : i32
    return %arg0, %c0_i32 : i32, i32
  }
}

</mosaic_0001>

<bundles_post_ra>
// kernel: tile.8
= control target key start
LH: loop header
LB: loop body
LE: loop exit
PB: predicated region body
PF: predicated region fallthrough
CT: control target
= control target key end

     0   :  { %s40_s0 = inlined_call_operand.vmem [shape: f32[4], index: 0, kind: input, shape index: {}]   ;;  %s41_s1 = inlined_call_operand.vmem [shape: f32[32,4], index: 1, kind: output, shape index: {}]  }
   0x1   :  { %v4_v0 = vld [vmem:[%s40_s0] ss:$0 sm:$0xff] }
   0x2   :  { %5 = vst [vmem:[%s41_s1] sm:$0xff] %v4_v0  ;;  %12 = vst [vmem:[%s41_s1 + $0x8] sm:$0xff] %v4_v0 }
   0x3   :  { %13 = vst [vmem:[%s41_s1 + $0x10] sm:$0xff] %v4_v0  ;;  %14 = vst [vmem:[%s41_s1 + $0x18] sm:$0xff] %v4_v0 }

// kernel: tile.9
= control target key start
LH: loop header
LB: loop body
LE: loop exit
PB: predicated region body
PF: predicated region fallthrough
CT: control target
= control target key end

     0   :  { %s259_s10 = smov 124   ;;  %s260_s11 = smov 116   ;;  %vm3_vm0 = vcmask 31744   ;;  %vm9_vm1 = vcmask 1048544   ;;  %vm15_vm2 = vcmask 1015744   ;;  %vm21_vm3 = vcmask 982944   ;;  %s399_s0 = inlined_call_operand.vmem [shape: f32[32,4], index: 0, kind: input, shape index: {}]   ;;  %s400_s1 = inlined_call_operand.vmem [shape: f32[1,128], index: 1, kind: output, shape index: {}]  }
   0x1   :  { %v197_v0 = vld [vmem:[%s399_s0 + $0x1f] sm:$0x1]   ;;  %v199_v1 = vld [vmem:[%s399_s0 + $0x1d] sm:$0x1]   ;;  %v198_v2 = vld [vmem:[%s399_s0 + $0x1e] sm:$0x1]  }
   0x2   :  { %7 = vrot.lane.b32.xlu0 %v197_v0, %s259_s10  ;;  %19 = vrot.lane.b32.xlu1 %v199_v1, %s260_s11  ;;  %v200_v3 = vld [vmem:[%s399_s0 + $0x1c] sm:$0x1]   ;;  %s261_s16 = smov 120   ;;  %s262_s17 = smov 112   ;;  %v201_v4 = vld [vmem:[%s399_s0 + $0x1b] sm:$0x1]  }
   0x3   :  { %v202_v5 = vld [vmem:[%s399_s0 + $0x1a] sm:$0x1]   ;;  %s263_s22 = smov 108   ;;  %s264_s23 = smov 104   ;;  %v203_v6 = vld [vmem:[%s399_s0 + $0x19] sm:$0x1]  }
   0x4   :  { %v204_v7 = vld [vmem:[%s399_s0 + $0x18] sm:$0x1]   ;;  %s265_s28 = smov 100   ;;  %s266_s29 = smov 96   ;;  %v205_v8 = vld [vmem:[%s399_s0 + $0x17] sm:$0x1]  }
   0x5   :  { %v206_v9 = vld [vmem:[%s399_s0 + $0x16] sm:$0x1]   ;;  %v2_v10 = vld [vmem:[%s399_s0] sm:$0x1]   ;;  %s267_s7 = smov 92   ;;  %s268_s8 = smov 88  }
   0x6   :  { %13 = vrot.lane.b32.xlu0 %v198_v2, %s261_s16  ;;  %25 = vrot.lane.b32.xlu1 %v200_v3, %s262_s17  ;;  %4 = vst.msk [vmem:[#allocation0] sm:$0x1] %vm3_vm0, %v2_v10   ;;  %v207_v11 = vld [vmem:[%s399_s0 + $0x15] sm:$0x1]   ;;  %v208_v12 = vld [vmem:[%s399_s0 + $0x14] sm:$0x1]  }
   0x7   :  { %s269_s13 = smov 84   ;;  %s270_s14 = smov 80   ;;  %v209_v13 = vld [vmem:[%s399_s0 + $0x13] sm:$0x1]   ;;  %v210_v14 = vld [vmem:[%s399_s0 + $0x12] sm:$0x1]  }
   0x8   :  { %s271_s19 = smov 76   ;;  %s272_s20 = smov 72   ;;  %v211_v15 = vld [vmem:[%s399_s0 + $0x11] sm:$0x1]   ;;  %v212_v16 = vld [vmem:[%s399_s0 + $0x10] sm:$0x1]  }
   0x9   :  { %s273_s25 = smov 68   ;;  %s274_s26 = smov 64   ;;  %v213_v17 = vld [vmem:[%s399_s0 + $0xf] sm:$0x1]   ;;  %v214_v18 = vld [vmem:[%s399_s0 + $0xe] sm:$0x1]  }
   0xa   :  { %31 = vrot.lane.b32.xlu0 %v201_v4, %s263_s22  ;;  %37 = vrot.lane.b32.xlu1 %v202_v5, %s264_s23  ;;  %s275_s2 = smov 60   ;;  %s276_s3 = smov 56   ;;  %v215_v19 = vld [vmem:[%s399_s0 + $0xd] sm:$0x1]   ;;  %v216_v20 = vld [vmem:[%s399_s0 + $0xc] sm:$0x1]  }
   0xb   :  { %s278_s9 = smov 48   ;;  %v217_v21 = vld [vmem:[%s399_s0 + $0xb] sm:$0x1]   ;;  %v218_v22 = vld [vmem:[%s399_s0 + $0xa] sm:$0x1]   ;;  %s280_s15 = smov 40  }
   0xc   :  { %v219_v23 = vld [vmem:[%s399_s0 + $0x9] sm:$0x1]   ;;  %v220_v24 = vld [vmem:[%s399_s0 + $0x8] sm:$0x1]   ;;  %s282_s21 = smov 32   ;;  %s284_s27 = smov 24  }
   0xd   :  { %v221_v25 = vld [vmem:[%s399_s0 + $0x7] sm:$0x1]   ;;  %v222_v26 = vld [vmem:[%s399_s0 + $0x6] sm:$0x1]   ;;  %v223_v27 = vld [vmem:[%s399_s0 + $0x5] sm:$0x1]  }
   0xe   :  { %43 = vrot.lane.b32.xlu0 %v203_v6, %s265_s28  ;;  %49 = vrot.lane.b32.xlu1 %v204_v7, %s266_s29  ;;  %v224_v28 = vld [vmem:[%s399_s0 + $0x4] sm:$0x1]   ;;  %s286_s4 = smov 16   ;;  %v225_v29 = vld [vmem:[%s399_s0 + $0x3] sm:$0x1]   ;;  %s288_s10 = smov 8  }
   0xf   :  { %v226_v30 = vld [vmem:[%s399_s0 + $0x2] sm:$0x1]   ;;  %v227_v31 = vld [vmem:[%s399_s0 + $0x1] sm:$0x1]   ;;  %s289_s0 = smov 4   ;;  %vm27_vm4 = vcmask 950144  }
  0x10   :  { %vm33_vm5 = vcmask 917344   ;;  %vm39_vm6 = vcmask 884544   ;;  %vm45_vm7 = vcmask 851744   ;;  %vm51_vm8 = vcmask 818944  }
  0x11   :  { %vm57_vm9 = vcmask 786144   ;;  %vm63_vm10 = vcmask 753344   ;;  %vm69_vm11 = vcmask 720544   ;;  %vm75_vm12 = vcmask 687744  }
  0x12   :  { %55 = vrot.lane.b32.xlu0 %v205_v8, %s267_s7  ;;  %61 = vrot.lane.b32.xlu1 %v206_v9, %s268_s8  ;;  %s277_s8 = smov 52   ;;  %vm81_vm13 = vcmask 654944   ;;  %vm87_vm14 = vcmask 622144   ;;  %vm93_vm15 = vcmask 589344   ;;  %vm99_vm0 = vcmask 556544  }
  0x16   :  { %67 = vrot.lane.b32.xlu0 %v207_v11, %s269_s13  ;;  %73 = vrot.lane.b32.xlu1 %v208_v12, %s270_s14  ;;  %s279_s14 = smov 44  }
  0x1a   :  { %79 = vrot.lane.b32.xlu0 %v209_v13, %s271_s19  ;;  %85 = vrot.lane.b32.xlu1 %v210_v14, %s272_s20  ;;  %s281_s20 = smov 36  }
  0x1e   :  { %91 = vrot.lane.b32.xlu0 %v211_v15, %s273_s25  ;;  %97 = vrot.lane.b32.xlu1 %v212_v16, %s274_s26  ;;  %s283_s26 = smov 28  }
  0x22   :  { %103 = vrot.lane.b32.xlu0 %v213_v17, %s275_s2  ;;  %109 = vrot.lane.b32.xlu1 %v214_v18, %s276_s3  ;;  %s285_s3 = smov 20  }
  0x26   :  { %115 = vrot.lane.b32.xlu0 %v215_v19, %s277_s8  ;;  %121 = vrot.lane.b32.xlu1 %v216_v20, %s278_s9  ;;  %s287_s9 = smov 12  }
  0x2a   :  { %127 = vrot.lane.b32.xlu0 %v217_v21, %s279_s14  ;;  %133 = vrot.lane.b32.xlu1 %v218_v22, %s280_s15 }
  0x2e   :  { %139 = vrot.lane.b32.xlu0 %v219_v23, %s281_s20  ;;  %145 = vrot.lane.b32.xlu1 %v220_v24, %s282_s21 }
  0x32   :  { %151 = vrot.lane.b32.xlu0 %v221_v25, %s283_s26  ;;  %157 = vrot.lane.b32.xlu1 %v222_v26, %s284_s27 }
  0x36   :  { %163 = vrot.lane.b32.xlu0 %v223_v27, %s285_s3  ;;  %169 = vrot.lane.b32.xlu1 %v224_v28, %s286_s4 }
  0x3a   :  { %175 = vrot.lane.b32.xlu0 %v225_v29, %s287_s9  ;;  %181 = vrot.lane.b32.xlu1 %v226_v30, %s288_s10 }
  0x3e   :  { %187 = vrot.lane.b32.xlu0 %v227_v31, %s289_s0 }
  0x74   :  { %v8_v32 = vpop.permute.xlu0 %7   ;;  %v20_v33 = vpop.permute.xlu1 %19  }
  0x75   :  { %10 = vst.msk [vmem:[#allocation0] sm:$0x1] %vm9_vm1, %v8_v32   ;;  %vm105_vm1 = vcmask 523744  }
  0x78   :  { %v14_v34 = vpop.permute.xlu0 %13   ;;  %v26_v35 = vpop.permute.xlu1 %25  }
  0x79   :  { %16 = vst.msk [vmem:[#allocation0] sm:$0x1] %vm15_vm2, %v14_v34   ;;  %vm111_vm2 = vcmask 490944  }
  0x7a   :  { %22 = vst.msk [vmem:[#allocation0] sm:$0x1] %vm21_vm3, %v20_v33   ;;  %vm117_vm3 = vcmask 458144  }
  0x7b   :  { %28 = vst.msk [vmem:[#allocation0] sm:$0x1] %vm27_vm4, %v26_v35   ;;  %vm123_vm4 = vcmask 425344  }
  0x7c   :  { %v32_v36 = vpop.permute.xlu0 %31   ;;  %v38_v37 = vpop.permute.xlu1 %37  }
  0x7d   :  { %34 = vst.msk [vmem:[#allocation0] sm:$0x1] %vm33_vm5, %v32_v36   ;;  %vm129_vm5 = vcmask 392544  }
  0x7e   :  { %40 = vst.msk [vmem:[#allocation0] sm:$0x1] %vm39_vm6, %v38_v37   ;;  %vm135_vm6 = vcmask 359744  }
  0x80   :  { %v44_v38 = vpop.permute.xlu0 %43   ;;  %v50_v39 = vpop.permute.xlu1 %49  }
  0x81   :  { %46 = vst.msk [vmem:[#allocation0] sm:$0x1] %vm45_vm7, %v44_v38   ;;  %vm141_vm7 = vcmask 326944  }
  0x82   :  { %52 = vst.msk [vmem:[#allocation0] sm:$0x1] %vm51_vm8, %v50_v39   ;;  %vm147_vm8 = vcmask 294144  }
  0x84   :  { %v56_v40 = vpop.permute.xlu0 %55   ;;  %v62_v41 = vpop.permute.xlu1 %61  }
  0x85   :  { %58 = vst.msk [vmem:[#allocation0] sm:$0x1] %vm57_vm9, %v56_v40   ;;  %vm153_vm9 = vcmask 261344  }
  0x86   :  { %64 = vst.msk [vmem:[#allocation0] sm:$0x1] %vm63_vm10, %v62_v41   ;;  %vm159_vm10 = vcmask 228544  }
  0x88   :  { %v68_v42 = vpop.permute.xlu0 %67   ;;  %v74_v43 = vpop.permute.xlu1 %73  }
  0x89   :  { %70 = vst.msk [vmem:[#allocation0] sm:$0x1] %vm69_vm11, %v68_v42   ;;  %vm165_vm11 = vcmask 195744  }
  0x8a   :  { %76 = vst.msk [vmem:[#allocation0] sm:$0x1] %vm75_vm12, %v74_v43   ;;  %vm171_vm12 = vcmask 162944  }
  0x8c   :  { %v80_v44 = vpop.permute.xlu0 %79   ;;  %v86_v45 = vpop.permute.xlu1 %85  }
  0x8d   :  { %82 = vst.msk [vmem:[#allocation0] sm:$0x1] %vm81_vm13, %v80_v44   ;;  %vm177_vm13 = vcmask 130144  }
  0x8e   :  { %88 = vst.msk [vmem:[#allocation0] sm:$0x1] %vm87_vm14, %v86_v45   ;;  %vm183_vm14 = vcmask 97344  }
  0x90   :  { %v92_v46 = vpop.permute.xlu0 %91   ;;  %v98_v47 = vpop.permute.xlu1 %97  }
  0x91   :  { %94 = vst.msk [vmem:[#allocation0] sm:$0x1] %vm93_vm15, %v92_v46   ;;  %vm189_vm15 = vcmask 64544  }
  0x92   :  { %100 = vst.msk [vmem:[#allocation0] sm:$0x1] %vm99_vm0, %v98_v47  }
  0x94   :  { %v104_v48 = vpop.permute.xlu0 %103   ;;  %v110_v49 = vpop.permute.xlu1 %109  }
  0x95   :  { %106 = vst.msk [vmem:[#allocation0] sm:$0x1] %vm105_vm1, %v104_v48  }
  0x96   :  { %112 = vst.msk [vmem:[#allocation0] sm:$0x1] %vm111_vm2, %v110_v49  }
  0x98   :  { %v116_v50 = vpop.permute.xlu0 %115   ;;  %v122_v51 = vpop.permute.xlu1 %121  }
  0x99   :  { %118 = vst.msk [vmem:[#allocation0] sm:$0x1] %vm117_vm3, %v116_v50  }
  0x9a   :  { %124 = vst.msk [vmem:[#allocation0] sm:$0x1] %vm123_vm4, %v122_v51  }
  0x9c   :  { %v128_v52 = vpop.permute.xlu0 %127   ;;  %v134_v53 = vpop.permute.xlu1 %133  }
  0x9d   :  { %130 = vst.msk [vmem:[#allocation0] sm:$0x1] %vm129_vm5, %v128_v52  }
  0x9e   :  { %136 = vst.msk [vmem:[#allocation0] sm:$0x1] %vm135_vm6, %v134_v53  }
  0xa0   :  { %v140_v54 = vpop.permute.xlu0 %139   ;;  %v146_v55 = vpop.permute.xlu1 %145  }
  0xa1   :  { %142 = vst.msk [vmem:[#allocation0] sm:$0x1] %vm141_vm7, %v140_v54  }
  0xa2   :  { %148 = vst.msk [vmem:[#allocation0] sm:$0x1] %vm147_vm8, %v146_v55  }
  0xa4   :  { %v152_v56 = vpop.permute.xlu0 %151   ;;  %v158_v57 = vpop.permute.xlu1 %157  }
  0xa5   :  { %154 = vst.msk [vmem:[#allocation0] sm:$0x1] %vm153_vm9, %v152_v56  }
  0xa6   :  { %160 = vst.msk [vmem:[#allocation0] sm:$0x1] %vm159_vm10, %v158_v57  }
  0xa8   :  { %v164_v58 = vpop.permute.xlu0 %163   ;;  %v170_v59 = vpop.permute.xlu1 %169  }
  0xa9   :  { %166 = vst.msk [vmem:[#allocation0] sm:$0x1] %vm165_vm11, %v164_v58  }
  0xaa   :  { %172 = vst.msk [vmem:[#allocation0] sm:$0x1] %vm171_vm12, %v170_v59  }
  0xac   :  { %v176_v60 = vpop.permute.xlu0 %175   ;;  %v182_v61 = vpop.permute.xlu1 %181  }
  0xad   :  { %178 = vst.msk [vmem:[#allocation0] sm:$0x1] %vm177_vm13, %v176_v60  }
  0xae   :  { %184 = vst.msk [vmem:[#allocation0] sm:$0x1] %vm183_vm14, %v182_v61  }
  0xb0   :  { %v188_v62 = vpop.permute.xlu0 %187  }
  0xb1   :  { %190 = vst.msk [vmem:[#allocation0] sm:$0x1] %vm189_vm15, %v188_v62  }
  0xb8   :  { %v194_v63 = vld [vmem:[#allocation0] sm:$0x1] }
  0xb9   :  { %196 = vst [vmem:[%s400_s1] sm:$0x1] %v194_v63 }

// kernel: restoration_forward_nchw.1
= control target key start
LH: loop header
LB: loop body
LE: loop exit
PB: predicated region body
PF: predicated region fallthrough
CT: control target
= control target key end

     0   :  { %v440_v0 = vmov 0   ;;  %s646_s4 = inlined_call_operand.vmem [shape: f32[16,1], index: 4, kind: input, shape index: {}]   ;;  %s647_s3 = inlined_call_operand.vmem [shape: f32[16,1], index: 3, kind: input, shape index: {}]   ;;  %s648_s1 = inlined_call_operand.vmem [shape: f32[384,128], index: 1, kind: input, shape index: {}]   ;;  %s649_s0 = inlined_call_operand.vmem [shape: f32[16,128], index: 0, kind: input, shape index: {}]   ;;  %s650_s2 = inlined_call_operand.vmem [shape: f32[1,128], index: 2, kind: input, shape index: {}]   ;;  %s651_s5 = inlined_call_operand.vmem [shape: f32[16,128], index: 5, kind: output, shape index: {}]  }
   0x1   :  { %439 = vset.pattern.permute.xlu1 %v440_v0  ;;  %438 = vset.pattern.permute.xlu0 %v440_v0  ;;  %v50_v1 = vld [vmem:[%s646_s4] sm:$0xff]  ;;  %v51_v3 = vld [vmem:[%s646_s4 + $0x8] sm:$0xff]  ;;  %v82_v10 = vld [vmem:[%s648_s1 + $0x90] sm:$0xff] }
   0x2   :  { %v31_v2 = vld [vmem:[%s647_s3] sm:$0xff]  ;;  %54 = vperm.xlu1 %439, %v50_v1   ;;  %v32_v4 = vld [vmem:[%s647_s3 + $0x8] sm:$0xff]  ;;  %v83_v12 = vld [vmem:[%s648_s1 + $0x98] sm:$0xff] }
   0x3   :  { %35 = vperm.xlu0 %438, %v31_v2   ;;  %v80_v5 = vld [vmem:[%s648_s1 + $0x80] sm:$0xff]  ;;  %v81_v6 = vld [vmem:[%s648_s1 + $0x88] sm:$0xff]  ;;  %v377_v15 = vpack.c.bf16 %v83_v12, %v82_v10  ;;  %v66_v17 = vld [vmem:[%s648_s1 + $0x10] sm:$0xff] }
   0x4   :  { %v373_v7 = vpack.c.bf16 %v81_v6, %v80_v5  ;;  %v64_v8 = vld [vmem:[%s648_s1] sm:$0xff]  ;;  %v65_v9 = vld [vmem:[%s648_s1 + $0x8] sm:$0xff]  ;;  %v67_v18 = vld [vmem:[%s648_s1 + $0x18] sm:$0xff] }
   0x5   :  { %v375_v11 = vpack.c.bf16 %v65_v9, %v64_v8  ;;  %v96_v13 = vld [vmem:[%s648_s1 + $0x100] sm:$0xff]  ;;  %v97_v14 = vld [vmem:[%s648_s1 + $0x108] sm:$0xff]  ;;  %v98_v21 = vld [vmem:[%s648_s1 + $0x110] sm:$0xff]  ;;  %v379_v23 = vpack.c.bf16 %v67_v18, %v66_v17 }
   0x6   :  { %374 = vmatprep.subr.bf16.mxu0 %v373_v7  ;;  %v405_v16 = vpack.c.bf16 %v97_v14, %v96_v13  ;;  %v84_v19 = vld [vmem:[%s648_s1 + $0xa0] sm:$0xff]  ;;  %59 = vperm.xlu1 %439, %v51_v3   ;;  %v85_v20 = vld [vmem:[%s648_s1 + $0xa8] sm:$0xff]  ;;  %v99_v22 = vld [vmem:[%s648_s1 + $0x118] sm:$0xff] }
   0x7   :  { %40 = vperm.xlu0 %438, %v32_v4   ;;  %376 = vmatpush3.bf16.msra.mxu0 %v375_v11  ;;  %v409_v24 = vpack.c.bf16 %v99_v22, %v98_v21  ;;  %v68_v25 = vld [vmem:[%s648_s1 + $0x20] sm:$0xff]  ;;  %v381_v26 = vpack.c.bf16 %v85_v20, %v84_v19  ;;  %v69_v27 = vld [vmem:[%s648_s1 + $0x28] sm:$0xff]  ;;  %v86_v30 = vld [vmem:[%s648_s1 + $0xb0] sm:$0xff] }
   0x8   :  { %406 = vmatprep.subr.bf16.mxu1 %v405_v16  ;;  %378 = vmatprep.subr.bf16.mxu0 %v377_v15  ;;  %v100_v28 = vld [vmem:[%s648_s1 + $0x120] sm:$0xff]  ;;  %v101_v29 = vld [vmem:[%s648_s1 + $0x128] sm:$0xff]  ;;  %v87_v31 = vld [vmem:[%s648_s1 + $0xb8] sm:$0xff]  ;;  %v383_v35 = vpack.c.bf16 %v69_v27, %v68_v25  ;;  %v26_v15 = vlaneseq }
   0x9   :  { %408 = vmatpush3.bf16.msra.mxu1 %v405_v16  ;;  %v413_v32 = vpack.c.bf16 %v101_v29, %v100_v28  ;;  %v102_v33 = vld [vmem:[%s648_s1 + $0x130] sm:$0xff]  ;;  %v103_v34 = vld [vmem:[%s648_s1 + $0x138] sm:$0xff]  ;;  %v385_v36 = vpack.c.bf16 %v87_v31, %v86_v30  ;;  %v88_v39 = vld [vmem:[%s648_s1 + $0xc0] sm:$0xff] }
   0xa   :  { %410 = vmatprep.subr.bf16.mxu1 %v409_v24  ;;  %v70_v37 = vld [vmem:[%s648_s1 + $0x30] sm:$0xff]  ;;  %v71_v38 = vld [vmem:[%s648_s1 + $0x38] sm:$0xff]  ;;  %v89_v40 = vld [vmem:[%s648_s1 + $0xc8] sm:$0xff]  ;;  %v417_v41 = vpack.c.bf16 %v103_v34, %v102_v33  ;;  %v27_v18 = vshrl.u32 %v26_v15, 7 }
   0xb   :  { %380 = vmatpush3.bf16.msra.mxu0 %v379_v23  ;;  %v104_v42 = vld [vmem:[%s648_s1 + $0x140] sm:$0xff]  ;;  %v105_v43 = vld [vmem:[%s648_s1 + $0x148] sm:$0xff]  ;;  %v387_v44 = vpack.c.bf16 %v71_v38, %v70_v37  ;;  %v389_v45 = vpack.c.bf16 %v89_v40, %v88_v39  ;;  %v90_v48 = vld [vmem:[%s648_s1 + $0xd0] sm:$0xff] }
   0xc   :  { %382 = vmatprep.subr.bf16.mxu0 %v381_v26  ;;  %v72_v46 = vld [vmem:[%s648_s1 + $0x40] sm:$0xff]  ;;  %v73_v47 = vld [vmem:[%s648_s1 + $0x48] sm:$0xff]  ;;  %v91_v49 = vld [vmem:[%s648_s1 + $0xd8] sm:$0xff]  ;;  %v421_v50 = vpack.c.bf16 %v105_v43, %v104_v42  ;;  %vm28_vm0 = vcmp.lt.s32.totalorder %v27_v18, 1  ;;  %vm47_vm1 = vcmp.lt.s32.totalorder %v27_v18, 7 }
   0xd   :  { %412 = vmatpush3.bf16.msra.mxu1 %v409_v24  ;;  %v582_v51 = vld [vmem:[%s649_s0] sm:$0xff]  ;;  %v106_v52 = vld [vmem:[%s648_s1 + $0x150] sm:$0xff]  ;;  %v107_v53 = vld [vmem:[%s648_s1 + $0x158] sm:$0xff]  ;;  %v391_v54 = vpack.c.bf16 %v73_v47, %v72_v46  ;;  %v393_v56 = vpack.c.bf16 %v91_v49, %v90_v48 }
   0xe   :  { %414 = vmatprep.subr.bf16.mxu1 %v413_v32  ;;  %v279_v55 = vadd.f32 -0.5, %v582_v51  ;;  %v74_v57 = vld [vmem:[%s648_s1 + $0x50] sm:$0xff]  ;;  %v75_v58 = vld [vmem:[%s648_s1 + $0x58] sm:$0xff]  ;;  %v92_v59 = vld [vmem:[%s648_s1 + $0xe0] sm:$0xff]  ;;  %v425_v61 = vpack.c.bf16 %v107_v53, %v106_v52 }
   0xf   :  { %384 = vmatpush3.bf16.msra.mxu0 %v383_v35  ;;  %v93_v60 = vld [vmem:[%s648_s1 + $0xe8] sm:$0xff]  ;;  %v108_v62 = vld [vmem:[%s648_s1 + $0x160] sm:$0xff]  ;;  %v395_v0 = vpack.c.bf16 %v75_v58, %v74_v57  ;;  %v94_v4 = vld [vmem:[%s648_s1 + $0xf0] sm:$0xff] }
  0x10   :  { %386 = vmatprep.subr.bf16.mxu0 %v385_v36  ;;  %176 = vmatprep.mubr.f32.mxu0 %v279_v55  ;;  %v109_v63 = vld [vmem:[%s648_s1 + $0x168] sm:$0xff]  ;;  %v397_v1 = vpack.c.bf16 %v93_v60, %v92_v59  ;;  %v76_v2 = vld [vmem:[%s648_s1 + $0x60] sm:$0xff]  ;;  %v95_v5 = vld [vmem:[%s648_s1 + $0xf8] sm:$0xff]  ;;  %v24_v19 = vrot.slane %v279_v55, 7  ;;  %v45_v21 = vrot.slane %v279_v55, 1 }
  0x11   :  { %416 = vmatpush3.bf16.msra.mxu1 %v413_v32  ;;  %v77_v3 = vld [vmem:[%s648_s1 + $0x68] sm:$0xff]  ;;  %v429_v6 = vpack.c.bf16 %v109_v63, %v108_v62  ;;  %v110_v7 = vld [vmem:[%s648_s1 + $0x170] sm:$0xff]  ;;  %v111_v8 = vld [vmem:[%s648_s1 + $0x178] sm:$0xff]  ;;  %v401_v10 = vpack.c.bf16 %v95_v5, %v94_v4 }
  0x12   :  { %418 = vmatprep.subr.bf16.mxu1 %v417_v41  ;;  %v399_v9 = vpack.c.bf16 %v77_v3, %v76_v2  ;;  %v78_v11 = vld [vmem:[%s648_s1 + $0x70] sm:$0xff]  ;;  %v79_v12 = vld [vmem:[%s648_s1 + $0x78] sm:$0xff]  ;;  %v433_v13 = vpack.c.bf16 %v111_v8, %v110_v7  ;;  %v21_v16 = vld [vmem:[%s649_s0 + $0x8] sm:$0xff] }
  0x13   :  { %388 = vmatpush3.bf16.msra.mxu0 %v387_v44  ;;  %v403_v14 = vpack.c.bf16 %v79_v12, %v78_v11  ;;  %v280_v17 = vadd.f32 -0.5, %v21_v16  ;;  %v281_v44 = vld [vmem:[%s650_s2] ss:$0 sm:$0xff] }
  0x14   :  { %390 = vmatprep.subr.bf16.mxu0 %v389_v45 }
  0x15   :  { %420 = vmatpush3.bf16.msra.mxu1 %v417_v41  ;;  %v25_v20 = vrot.slane %v280_v17, 7  ;;  %v46_v22 = vrot.slane %v280_v17, 1 }
  0x16   :  { %422 = vmatprep.subr.bf16.mxu1 %v421_v50 }
  0x17   :  { %392 = vmatpush3.bf16.msra.mxu0 %v391_v54  ;;  %v30_v23 = vsel %vm28_vm0, %v25_v20, %v24_v19  ;;  %v48_v24 = vsel %vm47_vm1, %v45_v21, %v46_v22  ;;  %v49_v29 = vsel %vm47_vm1, %v46_v22, %v45_v21  ;;  %v29_v30 = vsel %vm28_vm0, %v24_v19, %v25_v20 }
  0x18   :  { %394 = vmatprep.subr.bf16.mxu0 %v393_v56 }
  0x19   :  { %424 = vmatpush3.bf16.msra.mxu1 %v421_v50 }
  0x1a   :  { %426 = vmatprep.subr.bf16.mxu1 %v425_v61 }
  0x1b   :  { %396 = vmatpush3.bf16.msra.mxu0 %v395_v0 }
  0x1c   :  { %398 = vmatprep.subr.bf16.mxu0 %v397_v1 }
  0x1d   :  { %428 = vmatpush3.bf16.msra.mxu1 %v425_v61 }
  0x1e   :  { %430 = vmatprep.subr.bf16.mxu1 %v429_v6 }
  0x1f   :  { %400 = vmatpush3.bf16.msra.mxu0 %v399_v9 }
  0x20   :  { %402 = vmatprep.subr.bf16.mxu0 %v401_v10 }
  0x21   :  { %432 = vmatpush3.bf16.msra.mxu1 %v429_v6 }
  0x22   :  { %434 = vmatprep.subr.bf16.mxu1 %v433_v13 }
  0x23   :  { %404 = vmatpush3.bf16.msra.mxu0 %v403_v14 }
  0x25   :  { %436 = vmatpush3.bf16.msra.mxu1 %v433_v13 }
  0x81   :  { %v55_v25 = vpop.permute.xlu1 %54 }
  0x82   :  { %v36_v26 = vpop.permute.xlu0 %35  ;;  %v62_v28 = vmul.f32 %v55_v25, %v48_v24 }
  0x83   :  { %v43_v27 = vmul.f32 %v36_v26, %v30_v23 }
  0x84   :  { %370 = vmatprep.mubr.f32.mxu1 %v62_v28 }
  0x85   :  { %177 = vmatmul.mubr.f32.vlgmr.msra.gmra.mrb[0].mxu0 %v43_v27  ;;  %v60_v31 = vpop.permute.xlu1 %59 }
  0x86   :  { %v41_v32 = vpop.permute.xlu0 %40  ;;  %181 = vmatprep.mubr.f32.mxu0 %v280_v17  ;;  %v63_v33 = vmul.f32 %v60_v31, %v49_v29 }
  0x87   :  { %v44_v34 = vmul.f32 %v41_v32, %v29_v30 }
  0x88   :  { %371 = vmatmul.mubr.f32.vlgmr.msra.gmra.mrb[0].mxu1 %v63_v33 }
  0x89   :  { %182 = vmatmul.mubr.f32.gmra.mrb[2].mxu0 %v44_v34 }
 0x158   :  { %v314_v35 = vpop.f32.mrb[0].mxu0 }
 0x159   :  { %v315_v36 = vpop.f32.mrb[1].mxu0 }
 0x15a   :  { %v316_v37 = vadd.f32 %v315_v36, %v314_v35 }
 0x15b   :  { %v372_v39 = vpop.f32.mrb[0].mxu1 }
 0x15c   :  { %v317_v38 = vpop.f32.mrb[2].mxu0  ;;  %v253_v41 = vpop.f32.mrb[1].mxu1 }
 0x15d   :  { %v318_v40 = vpop.f32.mrb[3].mxu0  ;;  %v254_v43 = vadd.f32 %v316_v37, %v253_v41 }
 0x15e   :  { %v319_v42 = vadd.f32 %v318_v40, %v317_v38 }
 0x15f   :  { %v262_v46 = vadd.f32 %v254_v43, %v582_v51 }
 0x160   :  { %v259_v45 = vadd.f32 %v372_v39, %v319_v42 }
 0x161   :  { %v271_v48 = vadd.f32 %v281_v44, %v262_v46 }
 0x162   :  { %v263_v47 = vadd.f32 %v259_v45, %v21_v16 }
 0x163   :  { %273 = vst [vmem:[%s651_s5] sm:$0xff] %v271_v48 }
 0x164   :  { %v272_v49 = vadd.f32 %v281_v44, %v263_v47 }
 0x166   :  { %274 = vst [vmem:[%s651_s5 + $0x8] sm:$0xff] %v272_v49 }

</bundles_post_ra>
